<compile_context>
chip_gen: v7x
topology: tpu7x:2x2x1
jax: 0.10.0
libtpu: 0.0.40
codegen_flags: <defaults>
</compile_context>

<pallas_src>
import functools

import jax
import jax.numpy as jnp
from jax.experimental import pallas as pl
from jax.experimental.pallas import tpu as pltpu


# ---------------------------------------------------------------------------
# Hardware-aware sizing helpers.
# ---------------------------------------------------------------------------
def _budgets():
    """(tile_budget_bytes, vmem_limit_bytes, split_rows_for_two_cores)."""
    kind = ""
    try:
        kind = jax.devices()[0].device_kind.lower()
    except Exception:
        pass
    if "v7" in kind:   # 64 MiB VMEM/TC, 2 TCs/chip, ~3.2 TB/s HBM
        return 24 << 20, 40 << 20, True
    if "v6" in kind:   # 128 MiB VMEM, ~1.4 TB/s HBM -> most headroom
        return 32 << 20, 64 << 20, False
    # v5e/v5p/v4/unknown: raise the default 16 MiB scoped limit, stay modest.
    return 12 << 20, 32 << 20, False


def _row_unit(dtype):
    # Minimum sublane tile: 8 rows (4-byte), 16 (2-byte), 32 (1-byte) dtypes.
    return {4: 8, 2: 16, 1: 32}.get(jnp.dtype(dtype).itemsize, 8)


def _round_up(x, unit):
    return -(-x // unit) * unit


def _choose_blocks(rows, m, bytes_per_elem, tile_budget, row_unit, split_rows):
    """Pick (block_rows, tile_m).

    Lane (contiguous H*W) dim is grown first for long DMA bursts; remaining
    budget goes to rows.  Full-extent blocks are used when a dim fits whole
    (always layout-legal); otherwise blocks are (row_unit, 128)-aligned and a
    cdiv grid with partial trailing blocks is used."""
    lane_unit = 128
    # --- lanes first: prefer the full H*W row ---
    if m * bytes_per_elem * row_unit <= tile_budget:
        tm = m
    else:
        tm = (tile_budget // (bytes_per_elem * row_unit)) // lane_unit * lane_unit
        tm = int(min(max(tm, lane_unit), (m // lane_unit) * lane_unit))
    # --- rows from whatever budget is left ---
    max_br = (tile_budget // (bytes_per_elem * tm)) // row_unit * row_unit
    max_br = int(max(max_br, row_unit))
    br = rows if rows <= max_br else max_br
    if split_rows and rows >= 2 * row_unit:
        # v7x: keep >= 2 blocks along the parallel row axis (one per TC).
        br = min(br, _round_up(pl.cdiv(rows, 2), row_unit))
    return br, tm


# ---------------------------------------------------------------------------
# Kernel 1: per-row shifted moments, accumulated in VMEM scratch over spatial
# tiles; single writeback of the (br, 1) results on the last reduction step.
# ---------------------------------------------------------------------------
def _actnorm_stats_kernel(x_ref, shift_ref, s_ref, q_ref,
                          shift_sc, s_sc, q_sc, *, m, tm):
    j = pl.program_id(1)
    nj = pl.num_programs(1)
    x = x_ref[...].astype(jnp.float32)               # (br, tm)

    @pl.when(j == 0)
    def _():
        shift_sc[...] = x[:, 0:1]                    # per-row shift (~ row mean)
        s_sc[...] = jnp.zeros_like(s_sc)
        q_sc[...] = jnp.zeros_like(q_sc)

    d = x - shift_sc[...]
    if m % tm != 0:                                  # static: mask ragged lane tail
        lane = j * tm + jax.lax.broadcasted_iota(jnp.int32, d.shape, 1)
        d = jnp.where(lane < m, d, 0.0)
    s_sc[...] += jnp.sum(d, axis=1, keepdims=True)
    q_sc[...] += jnp.sum(d * d, axis=1, keepdims=True)

    @pl.when(j == nj - 1)
    def _():
        shift_ref[...] = shift_sc[...]
        s_ref[...] = s_sc[...]
        q_ref[...] = q_sc[...]


# ---------------------------------------------------------------------------
# Kernel 2: y = scale * (x + loc) with per-row loc/scale, native-dtype I/O.
# ---------------------------------------------------------------------------
def _actnorm_apply_kernel(loc_ref, scale_ref, x_ref, y_ref):
    x = x_ref[...].astype(jnp.float32)               # (br, tm)
    y_ref[...] = (scale_ref[...] * (x + loc_ref[...])).astype(y_ref.dtype)


# ---------------------------------------------------------------------------
# Wrappers.
# ---------------------------------------------------------------------------
def actnorm_row_params(loc, scale, n):
    """Precompute per-row (N*C, 1) f32 loc/scale once for repeated forwards."""
    c = loc.shape[1]
    loc_r = jnp.broadcast_to(loc.reshape(1, c).astype(jnp.float32), (n, c))
    scale_r = jnp.broadcast_to(scale.reshape(1, c).astype(jnp.float32), (n, c))
    return loc_r.reshape(n * c, 1), scale_r.reshape(n * c, 1)


def actnorm_forward(x_nchw, loc, scale, *, row_params=None, block_override=None):
    """Forward with fixed loc/scale (1,C,1,1): y = scale * (x + loc)."""
    n, c, h, w = x_nchw.shape
    rows, m = n * c, h * w
    x_rm = x_nchw.reshape(rows, m)                   # zero-copy NCHW view
    itemsize = jnp.dtype(x_nchw.dtype).itemsize

    if row_params is None:                           # hoist this for steady-state use
        loc_r, scale_r = actnorm_row_params(loc, scale, n)
    else:
        loc_r, scale_r = row_params

    tile_budget, vmem_limit, split_rows = _budgets()
    if block_override is not None:
        br, tm = block_override
    else:
        # per elem: in + out double-buffered at native width, + one f32 temp
        br, tm = _choose_blocks(rows, m, 4 * itemsize + 4, tile_budget,
                                _row_unit(x_nchw.dtype), split_rows)

    y_rm = pl.pallas_call(
        _actnorm_apply_kernel,
        out_shape=jax.ShapeDtypeStruct((rows, m), x_nchw.dtype),
        grid=(pl.cdiv(rows, br), pl.cdiv(m, tm)),
        in_specs=[
            pl.BlockSpec((br, 1), lambda i, j: (i, 0)),    # loc  (per-row)
            pl.BlockSpec((br, 1), lambda i, j: (i, 0)),    # scale (per-row)
            pl.BlockSpec((br, tm), lambda i, j: (i, j)),   # x tile
        ],
        out_specs=pl.BlockSpec((br, tm), lambda i, j: (i, j)),
        compiler_params=pltpu.CompilerParams(
            dimension_semantics=("parallel", "parallel"),
            vmem_limit_bytes=vmem_limit),
        cost_estimate=pl.CostEstimate(
            flops=2 * rows * m, transcendentals=0,
            bytes_accessed=2 * rows * m * itemsize + 2 * rows * 4),
    )(loc_r, scale_r, x_rm)

    return y_rm.reshape(n, c, h, w)


def actnorm_init_forward(x_nchw, *, block_override=None):
    """First forward: data-dependent init of loc/scale, then apply.

    Returns (y, loc (1,C,1,1), scale (1,C,1,1)) — matches the PyTorch module's
    first call (initialize + forward)."""
    n, c, h, w = x_nchw.shape
    rows, m = n * c, h * w
    count = n * h * w                                # elements per channel
    x_rm = x_nchw.reshape(rows, m)                   # zero-copy NCHW view
    itemsize = jnp.dtype(x_nchw.dtype).itemsize

    tile_budget, vmem_limit, split_rows = _budgets()
    if block_override is not None:
        br, tm = block_override
    else:
        # per elem: input double-buffered at native width, + f32 working temps
        br, tm = _choose_blocks(rows, m, 2 * itemsize + 8, tile_budget,
                                _row_unit(x_nchw.dtype), split_rows)

    shift, rsum, rsq = pl.pallas_call(
        functools.partial(_actnorm_stats_kernel, m=m, tm=tm),
        out_shape=(
            jax.ShapeDtypeStruct((rows, 1), jnp.float32),
            jax.ShapeDtypeStruct((rows, 1), jnp.float32),
            jax.ShapeDtypeStruct((rows, 1), jnp.float32),
        ),
        grid=(pl.cdiv(rows, br), pl.cdiv(m, tm)),    # reduction axis last
        in_specs=[pl.BlockSpec((br, tm), lambda i, j: (i, j))],
        out_specs=(
            pl.BlockSpec((br, 1), lambda i, j: (i, 0)),
            pl.BlockSpec((br, 1), lambda i, j: (i, 0)),
            pl.BlockSpec((br, 1), lambda i, j: (i, 0)),
        ),
        scratch_shapes=[
            pltpu.VMEM((br, 1), jnp.float32),
            pltpu.VMEM((br, 1), jnp.float32),
            pltpu.VMEM((br, 1), jnp.float32),
        ],
        compiler_params=pltpu.CompilerParams(
            dimension_semantics=("parallel", "arbitrary"),
            vmem_limit_bytes=vmem_limit),
        cost_estimate=pl.CostEstimate(
            flops=4 * rows * m, transcendentals=0,
            bytes_accessed=rows * m * itemsize + 3 * rows * 4),
    )(x_rm)

    # Tiny per-channel combine (plain JAX).  Shifted estimator:
    #   sum(x)            = S_r + m * shift_r
    #   sum((x - mean)^2) = Q_r + 2 (shift_r - mean) S_r + m (shift_r - mean)^2
    s_r = shift.reshape(n, c)
    S_r = rsum.reshape(n, c)
    Q_r = rsq.reshape(n, c)
    mean = (S_r + jnp.float32(m) * s_r).sum(axis=0) / jnp.float32(count)
    d_r = s_r - mean[None, :]
    css = (Q_r + 2.0 * d_r * S_r + jnp.float32(m) * d_r * d_r).sum(axis=0)
    var = css / jnp.float32(max(count - 1, 1))       # unbiased (torch.std default)
    std = jnp.sqrt(jnp.maximum(var, 0.0))

    loc_ch = -mean                                   # (C,)
    scale_ch = 1.0 / (std + 1e-6)                    # (C,)
    loc = loc_ch.reshape(1, c, 1, 1)
    scale = scale_ch.reshape(1, c, 1, 1)

    # Build the per-row vectors once here (hoisted out of the apply wrapper).
    row_params = (
        jnp.broadcast_to(loc_ch[None, :], (n, c)).reshape(rows, 1),
        jnp.broadcast_to(scale_ch[None, :], (n, c)).reshape(rows, 1),
    )
    y = actnorm_forward(x_nchw, loc, scale, row_params=row_params,
                        block_override=block_override)
    return y, loc, scale


# ---------------------------------------------------------------------------
# Pure-JAX reference (mirrors the PyTorch module exactly).
# ---------------------------------------------------------------------------
def actnorm_ref(x_nchw):
    n, c, h, w = x_nchw.shape
    flat = jnp.transpose(x_nchw, (1, 0, 2, 3)).reshape(c, -1).astype(jnp.float32)
    mean = flat.mean(axis=1).reshape(1, c, 1, 1)
    std = jnp.std(flat, axis=1, ddof=1).reshape(1, c, 1, 1)   # unbiased, like torch
    loc = -mean
    scale = 1.0 / (std + 1e-6)
    y = (scale * (x_nchw.astype(jnp.float32) + loc)).astype(x_nchw.dtype)
    return y, loc, scale


if __name__ == "__main__":
    key = jax.random.PRNGKey(0)
    # ActNorm(in_channel=4): the deterministic zeros/ones init is superseded by
    # the data-dependent first forward.
    x = jax.random.normal(key, (2, 4, 16, 16), dtype=jnp.float32) * 1.7 + 0.3

    # First forward: data-dependent init (stats kernel) + apply.
    y, loc, scale = actnorm_init_forward(x)
    y = jax.block_until_ready(y)
    y_ref, loc_ref, scale_ref = actnorm_ref(x)
    assert jnp.allclose(y, y_ref, atol=1e-5, rtol=1e-5), "init-forward mismatch"
    assert jnp.allclose(loc, loc_ref, atol=1e-5, rtol=1e-5), "loc mismatch"
    assert jnp.allclose(scale, scale_ref, atol=1e-5, rtol=1e-5), "scale mismatch"

    # Steady-state forward with fixed params; per-row params hoisted once.
    row_params = actnorm_row_params(loc, scale, x.shape[0])
    x2 = jax.random.normal(jax.random.PRNGKey(1), (2, 4, 16, 16), dtype=jnp.float32)
    y2 = jax.block_until_ready(
        actnorm_forward(x2, loc, scale, row_params=row_params))
    assert jnp.allclose(y2, scale_ref * (x2 + loc_ref), atol=1e-5, rtol=1e-5), \
        "apply-forward mismatch"

    # Ragged-shape path: force (8, 128) blocks on H*W = 288 so the cdiv grid and
    # lane-tail masking in the stats kernel are exercised on-device.
    x3 = jax.random.normal(jax.random.PRNGKey(2), (2, 4, 16, 18),
                           dtype=jnp.float32) * 0.9 - 1.2
    y3, loc3, scale3 = actnorm_init_forward(x3, block_override=(8, 128))
    y3 = jax.block_until_ready(y3)
    y3_ref, loc3_ref, scale3_ref = actnorm_ref(x3)
    assert jnp.allclose(y3, y3_ref, atol=1e-5, rtol=1e-5), "ragged forward mismatch"
    assert jnp.allclose(loc3, loc3_ref, atol=1e-5, rtol=1e-5), "ragged loc mismatch"
    assert jnp.allclose(scale3, scale3_ref, atol=1e-5, rtol=1e-5), "ragged scale mismatch"

    # TODO(synk): the PyTorch module's `initialized` uint8 buffer / in-place
    # parameter mutation is Python-level state; callers use actnorm_init_forward
    # once, then actnorm_forward with the returned params.
    print("KERNEL_OK")
</pallas_src>

<mosaic_0001>
module attributes {stable_mosaic.version = 11 : i64} {
  func.func @_actnorm_stats_kernel(%arg0: i32, %arg1: i32, %arg2: memref<8x256xf32, #tpu.memory_space<vmem>>, %arg3: memref<8x1xf32, #tpu.memory_space<vmem>>, %arg4: memref<8x1xf32, #tpu.memory_space<vmem>>, %arg5: memref<8x1xf32, #tpu.memory_space<vmem>>, %arg6: memref<8x1xf32, #tpu.memory_space<vmem>>, %arg7: memref<8x1xf32, #tpu.memory_space<vmem>>, %arg8: memref<8x1xf32, #tpu.memory_space<vmem>>) attributes {dimension_semantics = [#tpu.dimension_semantics<parallel>, #tpu.dimension_semantics<arbitrary>], iteration_bounds = array<i64: 1, 1>, scalar_prefetch = 0 : i64, scratch_operands = 3 : i64, tpu.core_type = #tpu.core_type<tc>, window_params = [{transform_indices = @transform_0, window_bounds = array<i64: 8, 256>}, {transform_indices = @transform_1, window_bounds = array<i64: 8, 1>}, {transform_indices = @transform_2, window_bounds = array<i64: 8, 1>}, {transform_indices = @transform_3, window_bounds = array<i64: 8, 1>}]} {
    %c0 = arith.constant 0 : index
    %c0_0 = arith.constant 0 : index
    %0 = vector.load %arg2[%c0, %c0_0] : memref<8x256xf32, #tpu.memory_space<vmem>>, vector<8x256xf32>
    %c0_i32 = arith.constant 0 : i32
    %1 = arith.cmpi eq, %arg1, %c0_i32 : i32
    %2 = arith.extui %1 : i1 to i32
    %c0_i32_1 = arith.constant 0 : i32
    %3 = arith.cmpi ne, %2, %c0_i32_1 : i32
    scf.if %3 {
      %21 = vector.extract_strided_slice %0 {offsets = [0, 0], sizes = [8, 1], strides = [1, 1]} : vector<8x256xf32> to vector<8x1xf32>
      %c0_15 = arith.constant 0 : index
      %c0_16 = arith.constant 0 : index
      %22 = vector.load %arg6[%c0_15, %c0_16] : memref<8x1xf32, #tpu.memory_space<vmem>>, vector<8x1xf32>
      tpu.vector_store %arg6[%c0_15, %c0_16], %21 {strides = array<i32>} : memref<8x1xf32, #tpu.memory_space<vmem>>, vector<8x1xf32>,
      %cst_17 = arith.constant 0.000000e+00 : f32
      %23 = vector.broadcast %cst_17 : f32 to vector<8x1xf32>
      %c0_18 = arith.constant 0 : index
      %c0_19 = arith.constant 0 : index
      %24 = vector.load %arg7[%c0_18, %c0_19] : memref<8x1xf32, #tpu.memory_space<vmem>>, vector<8x1xf32>
      tpu.vector_store %arg7[%c0_18, %c0_19], %23 {strides = array<i32>} : memref<8x1xf32, #tpu.memory_space<vmem>>, vector<8x1xf32>,
      %cst_20 = arith.constant 0.000000e+00 : f32
      %25 = vector.broadcast %cst_20 : f32 to vector<8x1xf32>
      %c0_21 = arith.constant 0 : index
      %c0_22 = arith.constant 0 : index
      %26 = vector.load %arg8[%c0_21, %c0_22] : memref<8x1xf32, #tpu.memory_space<vmem>>, vector<8x1xf32>
      tpu.vector_store %arg8[%c0_21, %c0_22], %25 {strides = array<i32>} : memref<8x1xf32, #tpu.memory_space<vmem>>, vector<8x1xf32>,
    } else {
    }
    %c0_2 = arith.constant 0 : index
    %c0_3 = arith.constant 0 : index
    %4 = vector.load %arg6[%c0_2, %c0_3] : memref<8x1xf32, #tpu.memory_space<vmem>>, vector<8x1xf32>
    %5 = vector.broadcast %4 : vector<8x1xf32> to vector<8x256xf32>
    %6 = arith.subf %0, %5 : vector<8x256xf32>
    %c0_4 = arith.constant 0 : index
    %c0_5 = arith.constant 0 : index
    %7 = vector.load %arg7[%c0_4, %c0_5] : memref<8x1xf32, #tpu.memory_space<vmem>>, vector<8x1xf32>
    %cst = arith.constant dense<0.000000e+00> : vector<8xf32>
    %8 = vector.multi_reduction <add>, %6, %cst [1] : vector<8x256xf32> to vector<8xf32>
    %9 = vector.shape_cast %8 : vector<8xf32> to vector<8x1xf32>
    %10 = arith.addf %7, %9 : vector<8x1xf32>
    %c0_6 = arith.constant 0 : index
    %c0_7 = arith.constant 0 : index
    %11 = vector.load %arg7[%c0_6, %c0_7] : memref<8x1xf32, #tpu.memory_space<vmem>>, vector<8x1xf32>
    tpu.vector_store %arg7[%c0_6, %c0_7], %10 {strides = array<i32>} : memref<8x1xf32, #tpu.memory_space<vmem>>, vector<8x1xf32>,
    %c0_8 = arith.constant 0 : index
    %c0_9 = arith.constant 0 : index
    %12 = vector.load %arg8[%c0_8, %c0_9] : memref<8x1xf32, #tpu.memory_space<vmem>>, vector<8x1xf32>
    %13 = arith.mulf %6, %6 : vector<8x256xf32>
    %cst_10 = arith.constant dense<0.000000e+00> : vector<8xf32>
    %14 = vector.multi_reduction <add>, %13, %cst_10 [1] : vector<8x256xf32> to vector<8xf32>
    %15 = vector.shape_cast %14 : vector<8xf32> to vector<8x1xf32>
    %16 = arith.addf %12, %15 : vector<8x1xf32>
    %c0_11 = arith.constant 0 : index
    %c0_12 = arith.constant 0 : index
    %17 = vector.load %arg8[%c0_11, %c0_12] : memref<8x1xf32, #tpu.memory_space<vmem>>, vector<8x1xf32>
    tpu.vector_store %arg8[%c0_11, %c0_12], %16 {strides = array<i32>} : memref<8x1xf32, #tpu.memory_space<vmem>>, vector<8x1xf32>,
    %c0_i32_13 = arith.constant 0 : i32
    %18 = arith.cmpi eq, %arg1, %c0_i32_13 : i32
    %19 = arith.extui %18 : i1 to i32
    %c0_i32_14 = arith.constant 0 : i32
    %20 = arith.cmpi ne, %19, %c0_i32_14 : i32
    scf.if %20 {
      %c0_15 = arith.constant 0 : index
      %c0_16 = arith.constant 0 : index
      %21 = vector.load %arg6[%c0_15, %c0_16] : memref<8x1xf32, #tpu.memory_space<vmem>>, vector<8x1xf32>
      %c0_17 = arith.constant 0 : index
      %c0_18 = arith.constant 0 : index
      %22 = vector.load %arg3[%c0_17, %c0_18] : memref<8x1xf32, #tpu.memory_space<vmem>>, vector<8x1xf32>
      tpu.vector_store %arg3[%c0_17, %c0_18], %21 {strides = array<i32>} : memref<8x1xf32, #tpu.memory_space<vmem>>, vector<8x1xf32>,
      %c0_19 = arith.constant 0 : index
      %c0_20 = arith.constant 0 : index
      %23 = vector.load %arg7[%c0_19, %c0_20] : memref<8x1xf32, #tpu.memory_space<vmem>>, vector<8x1xf32>
      %c0_21 = arith.constant 0 : index
      %c0_22 = arith.constant 0 : index
      %24 = vector.load %arg4[%c0_21, %c0_22] : memref<8x1xf32, #tpu.memory_space<vmem>>, vector<8x1xf32>
      tpu.vector_store %arg4[%c0_21, %c0_22], %23 {strides = array<i32>} : memref<8x1xf32, #tpu.memory_space<vmem>>, vector<8x1xf32>,
      %c0_23 = arith.constant 0 : index
      %c0_24 = arith.constant 0 : index
      %25 = vector.load %arg8[%c0_23, %c0_24] : memref<8x1xf32, #tpu.memory_space<vmem>>, vector<8x1xf32>
      %c0_25 = arith.constant 0 : index
      %c0_26 = arith.constant 0 : index
      %26 = vector.load %arg5[%c0_25, %c0_26] : memref<8x1xf32, #tpu.memory_space<vmem>>, vector<8x1xf32>
      tpu.vector_store %arg5[%c0_25, %c0_26], %25 {strides = array<i32>} : memref<8x1xf32, #tpu.memory_space<vmem>>, vector<8x1xf32>,
    } else {
    }
    return
  }
  func.func @transform_0(%arg0: i32, %arg1: i32) -> (i32, i32) {
    %c0_i32 = arith.constant 0 : i32
    return %arg0, %arg1 : i32, i32
  }
  func.func @transform_1(%arg0: i32, %arg1: i32) -> (i32, i32) {
    %c0_i32 = arith.constant 0 : i32
    %c0_i32_0 = arith.constant 0 : i32
    return %arg0, %c0_i32 : i32, i32
  }
  func.func @transform_2(%arg0: i32, %arg1: i32) -> (i32, i32) {
    %c0_i32 = arith.constant 0 : i32
    %c0_i32_0 = arith.constant 0 : i32
    return %arg0, %c0_i32 : i32, i32
  }
  func.func @transform_3(%arg0: i32, %arg1: i32) -> (i32, i32) {
    %c0_i32 = arith.constant 0 : i32
    %c0_i32_0 = arith.constant 0 : i32
    return %arg0, %c0_i32 : i32, i32
  }
}

</mosaic_0001>

<bundles_post_ra>
// kernel: tpu_custom_call.1
= control target key start
LH: loop header
LB: loop body
LE: loop exit
PB: predicated region body
PF: predicated region fallthrough
CT: control target
= control target key end

     0   :  { %9 = vsyncpa [#allocation6], 0  ;;  %s106_s12 = smov [#allocation5]   ;;  %s158_s0 = inlined_call_operand.hbm [shape: f32[8,256], index: 0, kind: input, shape index: {}]   ;;  %s159_s1 = inlined_call_operand.vmem [shape: f32[8,1], index: 1, kind: output, shape index: {0}]   ;;  %s160_s2 = inlined_call_operand.vmem [shape: f32[8,1], index: 2, kind: output, shape index: {1}]   ;;  %s161_s3 = inlined_call_operand.vmem [shape: f32[8,1], index: 3, kind: output, shape index: {2}]  }
   0x1   :  { %s16_s13 = sshll.u32 %s106_s12, 4  ;;  %s82_s16 = scalar_lea.hbm %s158_s0, 256  ;;  %s17_s13 = int_to_ptr.vmem [resolvable:$true] %s16_s13 }
   0x2   :  { %p83_p0 = scmp.ne.s32.totalorder %s158_s0, %s82_s16  ;;  %p86_p1 = scmp.lt.u32.totalorder %s82_s16, %s158_s0 }
   0x4   :  { %p88_p2 = pnand %p86_p1, %p83_p0 }
   0x6   :  { %91 = shalt.err (!%p88_p2)
}
   0x7   :  { %s92_s21 = scalar_lea.vmem %s17_s13, 256  ;;  %p97_p4 = scmp.lt.s32.totalorder %s17_s13, %s17_s13 }
   0x8   :  { %p93_p3 = scmp.ne.s32.totalorder %s17_s13, %s92_s21  ;;  %p98_p5 = scmp.lt.s32.totalorder %s92_s21, %s92_s21 }
   0xa   :  { %p99_p6 = por %p98_p5, %p97_p4 }
   0xc   :  { %p100_p7 = pnand %p99_p6, %p93_p3 }
   0xe   :  { %103 = shalt.err (!%p100_p7)
}
   0xf   :  { %19 = dma.hbm_to_vmem [thread:$0]  %s158_s0, 256, %s17_s13, [#allocation6]  }
  0x10   :  { %104 = dma.done.wait [#allocation6], 256  }
  0x11   :  { %105 = vsyncadd [#allocation6], 4294967040  ;;  %v107_v0 = vmov 0   ;;  %vm29_vm0 = vcmask 7168   ;;  %v23_v1 = vld [vmem:[#allocation5] sm:$0xff]  ;;  %v108_v3 = vmov 0.0  }
  0x12   :  { %81 = vset.pattern.permute.xlu0 %v107_v0  ;;  %30 = vst.msk [vmem:[#allocation2] sm:$0xff] %vm29_vm0, %v23_v1  ;;  %31 = vst.msk [vmem:[#allocation3] sm:$0xff] %vm29_vm0, %v108_v3  ;;  %v24_v4 = vld [vmem:[#allocation5 + $0x8] sm:$0xff] }
  0x13   :  { %32 = vst.msk [vmem:[#allocation4] sm:$0xff] %vm29_vm0, %v108_v3 }
  0x19   :  { %v33_v2 = vld [vmem:[#allocation2] sm:$0xff]  ;;  %v41_v12 = vld [vmem:[#allocation3] sm:$0xff] }
  0x1a   :  { %60 = vst.msk [vmem:[%s159_s1] sm:$0xff] %vm29_vm0, %v33_v2  ;;  %36 = vperm.xlu0 %81, %v33_v2   ;;  %v48_v14 = vld [vmem:[#allocation4] sm:$0xff] }
  0x99   :  { %v37_v5 = vpop.permute.xlu0 %36 }
  0x9a   :  { %v39_v6 = vsub.f32 %v23_v1, %v37_v5  ;;  %v40_v7 = vsub.f32 %v24_v4, %v37_v5 }
  0x9c   :  { %v42_v8 = vadd.f32 %v40_v7, %v39_v6  ;;  %v49_v9 = vmul.f32 %v39_v6, %v39_v6  ;;  %v50_v10 = vmul.f32 %v40_v7, %v40_v7 }
  0x9e   :  { %43 = vadd.xlane.f32.xlu0 %v42_v8  ;;  %v51_v11 = vadd.f32 %v50_v10, %v49_v9 }
  0xa0   :  { %52 = vadd.xlane.f32.xlu1 %v51_v11 }
 0x12b   :  { %v44_v13 = vpop.xlane.xlu0 %43 }
 0x12c   :  { %v45_v15 = vadd.f32 %v44_v13, %v41_v12 }
 0x12d   :  { %v53_v16 = vpop.xlane.xlu1 %52 }
 0x12e   :  { %47 = vst.msk [vmem:[#allocation3] sm:$0xff] %vm29_vm0, %v45_v15  ;;  %v54_v17 = vadd.f32 %v53_v16, %v48_v14 }
 0x130   :  { %55 = vst.msk [vmem:[#allocation4] sm:$0xff] %vm29_vm0, %v54_v17 }
 0x135   :  { %v61_v18 = vld [vmem:[#allocation3] sm:$0xff] }
 0x136   :  { %62 = vst.msk [vmem:[%s160_s2] sm:$0xff] %vm29_vm0, %v61_v18 }
 0x137   :  { %v63_v19 = vld [vmem:[#allocation4] sm:$0xff] }
 0x138   :  { %64 = vst.msk [vmem:[%s161_s3] sm:$0xff] %vm29_vm0, %v63_v19 }
 0x139   :  { %77 = vsyncpa [#allocation6], 1 }

</bundles_post_ra>
